<compile_context>
chip_gen: v7x
topology: tpu7x:2x2x1
jax: 0.10.0
libtpu: 0.0.40
codegen_flags: <defaults>
</compile_context>

<pallas_src>
import jax
import jax.numpy as jnp
from jax.experimental import pallas as pl
from jax.experimental.pallas import tpu as pltpu


# --------------------------------------------------------------------------
# Kernel
# --------------------------------------------------------------------------
def _mlp_kernel(x_ref, w13_ref, w2_ref, o_ref, acc_ref):
    # x_ref:   (tm, H)
    # w13_ref: (2, H, ti)   plane 0 = W1^T chunk, plane 1 = W3^T chunk
    # w2_ref:  (ti, H)
    # o_ref:   (tm, H)
    # acc_ref: (tm, H) f32 scratch, resident across the I (k) grid axis
    k = pl.program_id(1)

    x = x_ref[...]
    gate = jnp.dot(x, w13_ref[0], preferred_element_type=jnp.float32)
    up = jnp.dot(x, w13_ref[1], preferred_element_type=jnp.float32)
    # SiLU(gate) * up on this I-chunk (EUP sigmoid + VPU muls hide under MXU).
    h = (gate * jax.nn.sigmoid(gate) * up).astype(w2_ref.dtype)
    partial = jnp.dot(h, w2_ref[...], preferred_element_type=jnp.float32)

    @pl.when(k == 0)
    def _():
        acc_ref[...] = partial          # first chunk: store, no zero-init pass

    @pl.when(k != 0)
    def _():
        acc_ref[...] += partial

    @pl.when(k == pl.num_programs(1) - 1)
    def _():
        o_ref[...] = acc_ref[...].astype(o_ref.dtype)


# --------------------------------------------------------------------------
# One-time weight preparation (NOT in the hot path)
# --------------------------------------------------------------------------
def prepare_mlp_weights(w1, w3, w2, *, dtype=None, pad_multiple=256):
    """Convert PyTorch (out_features, in_features) weights into the layout the
    kernel consumes.  Call once at weight-load time.

    Returns:
      w13: (2, H, Ip)  stacked [W1^T, W3^T], intermediate dim zero-padded
      w2t: (Ip, H)     W2^T with matching zero-padded rows
    Padded lanes contribute exactly 0 (silu(0) * 0 == 0), so the result is
    bit-for-bit unaffected.  Pass dtype=jnp.bfloat16 to cast weights once.
    """
    if dtype is not None:
        w1, w3, w2 = (w.astype(dtype) for w in (w1, w3, w2))
    I, H = w1.shape
    Ip = ((I + pad_multiple - 1) // pad_multiple) * pad_multiple
    pad = Ip - I

    w1t, w3t, w2t = w1.T, w3.T, w2.T          # (H, I), (H, I), (I, H)
    if pad:
        w1t = jnp.pad(w1t, ((0, 0), (0, pad)))
        w3t = jnp.pad(w3t, ((0, 0), (0, pad)))
        w2t = jnp.pad(w2t, ((0, pad), (0, 0)))
    w13 = jnp.stack([w1t, w3t], axis=0)       # (2, H, Ip)
    return w13, w2t


# --------------------------------------------------------------------------
# Forward wrapper
# --------------------------------------------------------------------------
def _vmem_capacity_bytes():
    try:
        return int(pltpu.get_tpu_info().vmem_capacity_bytes)
    except Exception:
        return 64 << 20  # conservative: valid on v5e / v6e / v7x


def _pick_tile(total, cap, step=128):
    """Largest multiple of `step` that divides `total` and is <= max(cap, step)."""
    t = min(cap, total)
    t = max(step, (t // step) * step)
    while total % t != 0:
        t -= step
    return t


def mlp_forward(x, w13, w2t, *, tm=None, ti=512):
    """x: (B, S, H).  w13: (2, H, Ip), w2t: (Ip, H) from prepare_mlp_weights."""
    B, S, H = x.shape
    assert w13.shape[1] == H and w2t.shape[1] == H
    Ip = w13.shape[2]
    M = B * S

    # Follow the (possibly bf16) weight dtype for activations.
    if jnp.dtype(w13.dtype).itemsize < jnp.dtype(x.dtype).itemsize:
        x = x.astype(w13.dtype)

    # --- tile sizing ---
    if tm is None:
        tm = 512 if M >= 1024 else 256        # bigger M tiles keep v6e off the HBM roofline
    tm_eff = min(tm, M)
    ti_eff = _pick_tile(Ip, ti)

    w_bytes = jnp.dtype(w13.dtype).itemsize
    x_bytes = jnp.dtype(x.dtype).itemsize

    cap = max(_vmem_capacity_bytes() - (8 << 20), 32 << 20)   # HW capacity minus reserve

    def need(tm_, ti_):
        return int(
            2 * 3 * H * ti_ * w_bytes        # (2,H,ti) w13 + (ti,H) w2 tiles, double-buffered
            + 2 * tm_ * H * x_bytes          # x tile (double-buffered)
            + 2 * tm_ * H * x_bytes          # out tile (double-buffered)
            + tm_ * H * 4                    # f32 accumulator scratch
            + 3 * tm_ * ti_ * 4              # gate / up / h temporaries
            + (16 << 20)                     # Mosaic internal scratch + headroom
        )

    # Auto-shrink until the footprint fits the device's VMEM (v7x = 64 MiB).
    while need(tm_eff, ti_eff) > cap:
        if ti_eff > 128:
            ti_eff = _pick_tile(Ip, ti_eff // 2)
        elif tm_eff > 128:
            tm_eff = max(128, tm_eff // 2)
        else:
            break

    pad_m = (-M) % tm_eff
    Mp = M + pad_m
    x2d = x.reshape(M, H)
    if pad_m:
        x2d = jnp.pad(x2d, ((0, pad_m), (0, 0)))

    grid = (Mp // tm_eff, Ip // ti_eff)
    vmem_limit = int(min(cap, max(need(tm_eff, ti_eff), 32 << 20)))

    out2d = pl.pallas_call(
        _mlp_kernel,
        out_shape=jax.ShapeDtypeStruct((Mp, H), x.dtype),
        grid_spec=pltpu.PrefetchScalarGridSpec(
            num_scalar_prefetch=0,
            grid=grid,
            in_specs=[
                pl.BlockSpec((tm_eff, H), lambda i, k: (i, 0)),       # x tile (resident over k)
                pl.BlockSpec((2, H, ti_eff), lambda i, k: (0, 0, k)),  # stacked W1^T/W3^T chunk
                pl.BlockSpec((ti_eff, H), lambda i, k: (k, 0)),        # W2^T chunk
            ],
            out_specs=pl.BlockSpec((tm_eff, H), lambda i, k: (i, 0)),
            scratch_shapes=[pltpu.VMEM((tm_eff, H), jnp.float32)],
        ),
        compiler_params=pltpu.CompilerParams(
            dimension_semantics=("parallel", "arbitrary"),
            vmem_limit_bytes=vmem_limit,
        ),
    )(x2d, w13, w2t)

    if pad_m:
        out2d = out2d[:M]
    return out2d.reshape(B, S, H)


# --------------------------------------------------------------------------
# Pure-JAX reference (PyTorch nn.Linear (out, in) convention)
# --------------------------------------------------------------------------
def mlp_reference(x, w1, w3, w2):
    gate = jnp.einsum("bsh,ih->bsi", x, w1)
    up = jnp.einsum("bsh,ih->bsi", x, w3)
    h = jax.nn.silu(gate) * up
    return jnp.einsum("bsi,hi->bsh", h, w2)


if __name__ == "__main__":
    # Small shapes consistent with the module: hidden=32, intermediate=64
    B, S, H, I = 2, 8, 32, 64
    key = jax.random.PRNGKey(0)
    kx, k1, k3, k2 = jax.random.split(key, 4)

    x = jax.random.normal(kx, (B, S, H), dtype=jnp.float32)
    # nn.Linear weights: (out_features, in_features); no bias (mlp_bias=False)
    w1 = jax.random.normal(k1, (I, H), dtype=jnp.float32) * 0.05
    w3 = jax.random.normal(k3, (I, H), dtype=jnp.float32) * 0.05
    w2 = jax.random.normal(k2, (H, I), dtype=jnp.float32) * 0.05

    # One-time weight layout conversion / padding (outside the hot path).
    w13, w2t = prepare_mlp_weights(w1, w3, w2)

    out = mlp_forward(x, w13, w2t)
    jax.block_until_ready(out)

    ref = mlp_reference(x, w1, w3, w2)
    assert out.shape == (B, S, H)
    assert jnp.allclose(out, ref, atol=1e-5, rtol=1e-5), "mismatch vs reference"
    print("KERNEL_OK")
</pallas_src>

<mosaic_0001>
module attributes {stable_mosaic.version = 11 : i64} {
  func.func @_mlp_kernel(%arg0: i32, %arg1: i32, %arg2: memref<16x32xf32, #tpu.memory_space<vmem>>, %arg3: memref<2x32x256xf32, #tpu.memory_space<vmem>>, %arg4: memref<256x32xf32, #tpu.memory_space<vmem>>, %arg5: memref<16x32xf32, #tpu.memory_space<vmem>>, %arg6: memref<16x32xf32, #tpu.memory_space<vmem>>) attributes {dimension_semantics = [#tpu.dimension_semantics<parallel>, #tpu.dimension_semantics<arbitrary>], iteration_bounds = array<i64: 1, 1>, scalar_prefetch = 0 : i64, scratch_operands = 1 : i64, tpu.core_type = #tpu.core_type<tc>, window_params = [{transform_indices = @transform_0, window_bounds = array<i64: 16, 32>}, {transform_indices = @transform_1, window_bounds = array<i64: 2, 32, 256>}, {transform_indices = @transform_2, window_bounds = array<i64: 256, 32>}, {transform_indices = @transform_3, window_bounds = array<i64: 16, 32>}]} {
    %c0 = arith.constant 0 : index
    %c0_0 = arith.constant 0 : index
    %0 = vector.load %arg2[%c0, %c0_0] : memref<16x32xf32, #tpu.memory_space<vmem>>, vector<16x32xf32>
    %c0_1 = arith.constant 0 : index
    %c0_2 = arith.constant 0 : index
    %c0_3 = arith.constant 0 : index
    %1 = vector.load %arg3[%c0_1, %c0_2, %c0_3] : memref<2x32x256xf32, #tpu.memory_space<vmem>>, vector<1x32x256xf32>
    %2 = vector.shape_cast %1 : vector<1x32x256xf32> to vector<32x256xf32>
    %cst = arith.constant dense<0.000000e+00> : vector<16x256xf32>
    %3 = tpu.matmul %0, %2, %cst {dimension_numbers = #tpu.dot_dimension_numbers<[1], [0], [0], [1], [0, 0, 1, 1], [], []>} : vector<16x32xf32>, vector<32x256xf32>, vector<16x256xf32> -> vector<16x256xf32>
    %c1 = arith.constant 1 : index
    %c0_4 = arith.constant 0 : index
    %c0_5 = arith.constant 0 : index
    %4 = vector.load %arg3[%c1, %c0_4, %c0_5] : memref<2x32x256xf32, #tpu.memory_space<vmem>>, vector<1x32x256xf32>
    %5 = vector.shape_cast %4 : vector<1x32x256xf32> to vector<32x256xf32>
    %cst_6 = arith.constant dense<0.000000e+00> : vector<16x256xf32>
    %6 = tpu.matmul %0, %5, %cst_6 {dimension_numbers = #tpu.dot_dimension_numbers<[1], [0], [0], [1], [0, 0, 1, 1], [], []>} : vector<16x32xf32>, vector<32x256xf32>, vector<16x256xf32> -> vector<16x256xf32>
    %7 = arith.negf %3 : vector<16x256xf32>
    %8 = math.exp %7 : vector<16x256xf32>
    %cst_7 = arith.constant 1.000000e+00 : f32
    %9 = vector.broadcast %cst_7 : f32 to vector<16x256xf32>
    %10 = arith.addf %9, %8 : vector<16x256xf32>
    %11 = arith.divf %9, %10 : vector<16x256xf32>
    %12 = arith.mulf %3, %11 : vector<16x256xf32>
    %13 = arith.mulf %12, %6 : vector<16x256xf32>
    %c0_8 = arith.constant 0 : index
    %c0_9 = arith.constant 0 : index
    %14 = vector.load %arg4[%c0_8, %c0_9] : memref<256x32xf32, #tpu.memory_space<vmem>>, vector<256x32xf32>
    %cst_10 = arith.constant dense<0.000000e+00> : vector<16x32xf32>
    %15 = tpu.matmul %13, %14, %cst_10 {dimension_numbers = #tpu.dot_dimension_numbers<[1], [0], [0], [1], [0, 0, 1, 1], [], []>} : vector<16x256xf32>, vector<256x32xf32>, vector<16x32xf32> -> vector<16x32xf32>
    %c0_i32 = arith.constant 0 : i32
    %16 = arith.cmpi eq, %arg1, %c0_i32 : i32
    %17 = arith.extui %16 : i1 to i32
    %c0_i32_11 = arith.constant 0 : i32
    %18 = arith.cmpi ne, %17, %c0_i32_11 : i32
    scf.if %18 {
      %c0_16 = arith.constant 0 : index
      %c0_17 = arith.constant 0 : index
      %25 = vector.load %arg6[%c0_16, %c0_17] : memref<16x32xf32, #tpu.memory_space<vmem>>, vector<16x32xf32>
      tpu.vector_store %arg6[%c0_16, %c0_17], %15 {strides = array<i32>} : memref<16x32xf32, #tpu.memory_space<vmem>>, vector<16x32xf32>,
    } else {
    }
    %c0_i32_12 = arith.constant 0 : i32
    %19 = arith.cmpi ne, %arg1, %c0_i32_12 : i32
    %20 = arith.extui %19 : i1 to i32
    %c0_i32_13 = arith.constant 0 : i32
    %21 = arith.cmpi ne, %20, %c0_i32_13 : i32
    scf.if %21 {
      %c0_16 = arith.constant 0 : index
      %c0_17 = arith.constant 0 : index
      %25 = vector.load %arg6[%c0_16, %c0_17] : memref<16x32xf32, #tpu.memory_space<vmem>>, vector<16x32xf32>
      %26 = arith.addf %25, %15 : vector<16x32xf32>
      %c0_18 = arith.constant 0 : index
      %c0_19 = arith.constant 0 : index
      %27 = vector.load %arg6[%c0_18, %c0_19] : memref<16x32xf32, #tpu.memory_space<vmem>>, vector<16x32xf32>
      tpu.vector_store %arg6[%c0_18, %c0_19], %26 {strides = array<i32>} : memref<16x32xf32, #tpu.memory_space<vmem>>, vector<16x32xf32>,
    } else {
    }
    %c0_i32_14 = arith.constant 0 : i32
    %22 = arith.cmpi eq, %arg1, %c0_i32_14 : i32
    %23 = arith.extui %22 : i1 to i32
    %c0_i32_15 = arith.constant 0 : i32
    %24 = arith.cmpi ne, %23, %c0_i32_15 : i32
    scf.if %24 {
      %c0_16 = arith.constant 0 : index
      %c0_17 = arith.constant 0 : index
      %25 = vector.load %arg6[%c0_16, %c0_17] : memref<16x32xf32, #tpu.memory_space<vmem>>, vector<16x32xf32>
      %c0_18 = arith.constant 0 : index
      %c0_19 = arith.constant 0 : index
      %26 = vector.load %arg5[%c0_18, %c0_19] : memref<16x32xf32, #tpu.memory_space<vmem>>, vector<16x32xf32>
      tpu.vector_store %arg5[%c0_18, %c0_19], %25 {strides = array<i32>} : memref<16x32xf32, #tpu.memory_space<vmem>>, vector<16x32xf32>,
    } else {
    }
    return
  }
  func.func @transform_0(%arg0: i32, %arg1: i32) -> (i32, i32) {
    %c0_i32 = arith.constant 0 : i32
    %c0_i32_0 = arith.constant 0 : i32
    return %arg0, %c0_i32 : i32, i32
  }
  func.func @transform_1(%arg0: i32, %arg1: i32) -> (i32, i32, i32) {
    %c0_i32 = arith.constant 0 : i32
    %c0_i32_0 = arith.constant 0 : i32
    %c0_i32_1 = arith.constant 0 : i32
    return %c0_i32, %c0_i32_0, %arg1 : i32, i32, i32
  }
  func.func @transform_2(%arg0: i32, %arg1: i32) -> (i32, i32) {
    %c0_i32 = arith.constant 0 : i32
    %c0_i32_0 = arith.constant 0 : i32
    return %arg1, %c0_i32 : i32, i32
  }
  func.func @transform_3(%arg0: i32, %arg1: i32) -> (i32, i32) {
    %c0_i32 = arith.constant 0 : i32
    %c0_i32_0 = arith.constant 0 : i32
    return %arg0, %c0_i32 : i32, i32
  }
}

</mosaic_0001>

<bundles_post_ra>
// kernel: tpu_custom_call.1
= control target key start
LH: loop header
LB: loop body
LE: loop exit
PB: predicated region body
PF: predicated region fallthrough
CT: control target
= control target key end

     0   :  { %v519_v7 = vmov 0.0   ;;  %s713_s0 = inlined_call_operand.vmem [shape: f32[16,32], index: 0, kind: input, shape index: {}]   ;;  %s714_s1 = inlined_call_operand.vmem [shape: f32[2,32,256], index: 1, kind: input, shape index: {}]   ;;  %s715_s2 = inlined_call_operand.vmem [shape: f32[256,32], index: 2, kind: input, shape index: {}]   ;;  %s716_s3 = inlined_call_operand.hbm [shape: f32[16,32], index: 3, kind: output, shape index: {}]  }
   0x1   :  { %v18_v0 = vld [vmem:[%s714_s1 + $0x8] sm:$0xff]  ;;  %v20_v1 = vld [vmem:[%s714_s1 + $0x18] sm:$0xff]  ;;  %v17_v2 = vld [vmem:[%s714_s1] sm:$0xff]  ;;  %96 = vmatprep.mubr.f32.mxu1 %v519_v7 }
   0x2   :  { %v427_v3 = vpack.c.bf16 %v20_v1, %v18_v0  ;;  %v19_v4 = vld [vmem:[%s714_s1 + $0x10] sm:$0xff]  ;;  %v22_v5 = vld [vmem:[%s714_s1 + $0x28] sm:$0xff]  ;;  %v24_v6 = vld [vmem:[%s714_s1 + $0x38] sm:$0xff] }
   0x3   :  { %v429_v8 = vpack.c.bf16 %v19_v4, %v17_v2  ;;  %v431_v9 = vpack.c.bf16 %v24_v6, %v22_v5  ;;  %v21_v10 = vld [vmem:[%s714_s1 + $0x20] sm:$0xff]  ;;  %v23_v11 = vld [vmem:[%s714_s1 + $0x30] sm:$0xff]  ;;  %v376_v12 = vld [vmem:[%s714_s1 + $0x48] sm:$0xff] }
   0x4   :  { %428 = vmatprep.subr.bf16.mxu1 %v427_v3  ;;  %v378_v13 = vld [vmem:[%s714_s1 + $0x58] sm:$0xff]  ;;  %v433_v14 = vpack.c.bf16 %v23_v11, %v21_v10  ;;  %v375_v16 = vld [vmem:[%s714_s1 + $0x40] sm:$0xff]  ;;  %v377_v17 = vld [vmem:[%s714_s1 + $0x50] sm:$0xff] }
   0x5   :  { %430 = vmatpush1.bf16.msra.mxu1 %v429_v8  ;;  %v435_v15 = vpack.c.bf16 %v378_v13, %v376_v12  ;;  %v380_v18 = vld [vmem:[%s714_s1 + $0x68] sm:$0xff]  ;;  %v382_v19 = vld [vmem:[%s714_s1 + $0x78] sm:$0xff] }
   0x6   :  { %432 = vmatprep.subr.bf16.mxu1 %v431_v9 }
   0x7   :  { %8 = vsyncpa [#allocation4], 0  ;;  %v15_v20 = vld [vmem:[%s713_s0] sm:$0xff]  ;;  %vm25_vm0 = vcmask 261120   ;;  %v437_v21 = vpack.c.bf16 %v377_v17, %v375_v16  ;;  %v439_v22 = vpack.c.bf16 %v382_v19, %v380_v18  ;;  %v381_v24 = vld [vmem:[%s714_s1 + $0x70] sm:$0xff] }
   0x8   :  { %v379_v23 = vld [vmem:[%s714_s1 + $0x60] sm:$0xff]  ;;  %v16_v25 = vld [vmem:[%s713_s0 + $0x8] sm:$0xff]  ;;  %v245_v33 = vld [vmem:[%s715_s2 + $0x90] sm:$0xff] }
   0x9   :  { %434 = vmatpush1.bf16.msra.mxu1 %v433_v14  ;;  %v441_v26 = vpack.c.bf16 %v381_v24, %v379_v23  ;;  %v243_v27 = vld [vmem:[%s715_s2 + $0x80] sm:$0xff]  ;;  %v244_v28 = vld [vmem:[%s715_s2 + $0x88] sm:$0xff]  ;;  %v246_v34 = vld [vmem:[%s715_s2 + $0x98] sm:$0xff] }
   0xa   :  { %436 = vmatprep.subr.bf16.mxu1 %v435_v15  ;;  %v443_v29 = vpack.c.bf16 %v244_v28, %v243_v27  ;;  %v227_v30 = vld [vmem:[%s715_s2] sm:$0xff]  ;;  %v228_v31 = vld [vmem:[%s715_s2 + $0x8] sm:$0xff]  ;;  %v447_v35 = vpack.c.bf16 %v246_v34, %v245_v33  ;;  %v229_v36 = vld [vmem:[%s715_s2 + $0x10] sm:$0xff] }
   0xb   :  { %v445_v32 = vpack.c.bf16 %v228_v31, %v227_v30  ;;  %v230_v37 = vld [vmem:[%s715_s2 + $0x18] sm:$0xff]  ;;  %v247_v39 = vld [vmem:[%s715_s2 + $0xa0] sm:$0xff]  ;;  %v248_v40 = vld [vmem:[%s715_s2 + $0xa8] sm:$0xff] }
   0xc   :  { %373 = vmatmul.mubr.msk.f32.vlgmr.msra.gmra.mrb[0].mxu1 %vm25_vm0, %v15_v20  ;;  %444 = vmatprep.subr.bf16.mxu0 %v443_v29  ;;  %v449_v38 = vpack.c.bf16 %v230_v37, %v229_v36  ;;  %v451_v41 = vpack.c.bf16 %v248_v40, %v247_v39  ;;  %v231_v42 = vld [vmem:[%s715_s2 + $0x20] sm:$0xff]  ;;  %v232_v43 = vld [vmem:[%s715_s2 + $0x28] sm:$0xff]  ;;  %v249_v45 = vld [vmem:[%s715_s2 + $0xb0] sm:$0xff] }
   0xd   :  { %102 = vmatprep.mubr.f32.mxu1 %v519_v7  ;;  %438 = vmatpush1.bf16.msra.mxu1 %v437_v21  ;;  %v453_v44 = vpack.c.bf16 %v232_v43, %v231_v42  ;;  %v250_v46 = vld [vmem:[%s715_s2 + $0xb8] sm:$0xff]  ;;  %v233_v48 = vld [vmem:[%s715_s2 + $0x30] sm:$0xff]  ;;  %v251_v51 = vld [vmem:[%s715_s2 + $0xc0] sm:$0xff] }
   0xe   :  { %440 = vmatprep.subr.bf16.mxu1 %v439_v22  ;;  %446 = vmatpush3.bf16.msra.mxu0 %v445_v32  ;;  %v455_v47 = vpack.c.bf16 %v250_v46, %v249_v45  ;;  %v234_v49 = vld [vmem:[%s715_s2 + $0x38] sm:$0xff]  ;;  %v252_v52 = vld [vmem:[%s715_s2 + $0xc8] sm:$0xff]  ;;  %v235_v54 = vld [vmem:[%s715_s2 + $0x40] sm:$0xff] }
   0xf   :  { %448 = vmatprep.subr.bf16.mxu0 %v447_v35  ;;  %v457_v50 = vpack.c.bf16 %v234_v49, %v233_v48  ;;  %v459_v53 = vpack.c.bf16 %v252_v52, %v251_v51  ;;  %v236_v55 = vld [vmem:[%s715_s2 + $0x48] sm:$0xff]  ;;  %v253_v57 = vld [vmem:[%s715_s2 + $0xd0] sm:$0xff]  ;;  %v254_v58 = vld [vmem:[%s715_s2 + $0xd8] sm:$0xff] }
  0x10   :  { %374 = vmatmul.mubr.msk.f32.gmra.mrb[2].mxu1 %vm25_vm0, %v16_v25  ;;  %v461_v56 = vpack.c.bf16 %v236_v55, %v235_v54  ;;  %v463_v59 = vpack.c.bf16 %v254_v58, %v253_v57  ;;  %v237_v60 = vld [vmem:[%s715_s2 + $0x50] sm:$0xff]  ;;  %v238_v61 = vld [vmem:[%s715_s2 + $0x58] sm:$0xff]  ;;  %v255_v63 = vld [vmem:[%s715_s2 + $0xe0] sm:$0xff] }
  0x11   :  { %442 = vmatpush1.bf16.msra.mxu1 %v441_v26  ;;  %182 = vmatprep.mubr.f32.mxu1 %v519_v7  ;;  %v465_v62 = vpack.c.bf16 %v238_v61, %v237_v60  ;;  %v256_v0 = vld [vmem:[%s715_s2 + $0xe8] sm:$0xff]  ;;  %v239_v2 = vld [vmem:[%s715_s2 + $0x60] sm:$0xff]  ;;  %v257_v5 = vld [vmem:[%s715_s2 + $0xf0] sm:$0xff] }
  0x12   :  { %450 = vmatpush3.bf16.msra.mxu0 %v449_v38  ;;  %v467_v1 = vpack.c.bf16 %v256_v0, %v255_v63  ;;  %v240_v3 = vld [vmem:[%s715_s2 + $0x68] sm:$0xff]  ;;  %v258_v6 = vld [vmem:[%s715_s2 + $0xf8] sm:$0xff]  ;;  %v241_v8 = vld [vmem:[%s715_s2 + $0x70] sm:$0xff] }
  0x13   :  { %452 = vmatprep.subr.bf16.mxu0 %v451_v41  ;;  %v469_v4 = vpack.c.bf16 %v240_v3, %v239_v2  ;;  %v242_v9 = vld [vmem:[%s715_s2 + $0x78] sm:$0xff]  ;;  %s520_s2 = smov [#allocation3]  }
  0x14   :  { %383 = vmatmul.mubr.msk.f32.vlgmr.msra.gmra.mrb[4].mxu1 %vm25_vm0, %v15_v20  ;;  %v473_v10 = vpack.c.bf16 %v242_v9, %v241_v8  ;;  %s362_s25 = sshll.u32 %s520_s2, 4  ;;  %s363_s25 = int_to_ptr.vmem [resolvable:$true] %s362_s25 }
  0x15   :  { %188 = vmatprep.mubr.f32.mxu1 %v519_v7  ;;  %v471_v7 = vpack.c.bf16 %v258_v6, %v257_v5  ;;  %s495_s26 = scalar_lea.vmem %s363_s25, 256  ;;  %p500_p1 = scmp.lt.s32.totalorder %s363_s25, %s363_s25 }
  0x16   :  { %454 = vmatpush3.bf16.msra.mxu0 %v453_v44  ;;  %p496_p0 = scmp.ne.s32.totalorder %s363_s25, %s495_s26  ;;  %p501_p2 = scmp.lt.s32.totalorder %s495_s26, %s495_s26 }
  0x17   :  { %456 = vmatprep.subr.bf16.mxu0 %v455_v47 }
  0x18   :  { %384 = vmatmul.mubr.msk.f32.gmra.mrb[6].mxu1 %vm25_vm0, %v16_v25  ;;  %p502_p3 = por %p501_p2, %p500_p1 }
  0x1a   :  { %458 = vmatpush3.bf16.msra.mxu0 %v457_v50  ;;  %p503_p4 = pnand %p502_p3, %p496_p0 }
  0x1b   :  { %460 = vmatprep.subr.bf16.mxu0 %v459_v53 }
  0x1e   :  { %462 = vmatpush3.bf16.msra.mxu0 %v461_v56 }
  0x1f   :  { %464 = vmatprep.subr.bf16.mxu0 %v463_v59 }
  0x22   :  { %466 = vmatpush3.bf16.msra.mxu0 %v465_v62 }
  0x23   :  { %468 = vmatprep.subr.bf16.mxu0 %v467_v1 }
  0x26   :  { %470 = vmatpush3.bf16.msra.mxu0 %v469_v4 }
  0x27   :  { %472 = vmatprep.subr.bf16.mxu0 %v471_v7 }
  0x2a   :  { %474 = vmatpush3.bf16.msra.mxu0 %v473_v10 }
  0xdf   :  { %v98_v11 = vpop.f32.mrb[0].mxu1 }
  0xe0   :  { %v385_v12 = vmul.f32 -1.442695, %v98_v11  ;;  %v100_v13 = vpop.f32.mrb[1].mxu1 }
  0xe1   :  { %v386_v14 = vmul.f32 -1.442695, %v100_v13 }
  0xe2   :  { %479 = vpow2.f32 %v385_v12 }
  0xe3   :  { %481 = vpow2.f32 %v386_v14  ;;  %v104_v15 = vpop.f32.mrb[2].mxu1 }
  0xe4   :  { %v387_v16 = vmul.f32 -1.442695, %v104_v15  ;;  %v106_v17 = vpop.f32.mrb[3].mxu1 }
  0xe5   :  { %v388_v18 = vmul.f32 -1.442695, %v106_v17 }
  0xe6   :  { %483 = vpow2.f32 %v387_v16 }
  0xe7   :  { %485 = vpow2.f32 %v388_v18  ;;  %v184_v19 = vpop.f32.mrb[4].mxu1 }
  0xe8   :  { %v186_v20 = vpop.f32.mrb[5].mxu1 }
  0xeb   :  { %v190_v21 = vpop.f32.mrb[6].mxu1 }
  0xec   :  { %v480_v22 = vpop.eup %479  ;;  %v192_v23 = vpop.f32.mrb[7].mxu1 }
  0xed   :  { %v482_v24 = vpop.eup %481  ;;  %v207_v25 = vadd.f32 1.0, %v480_v22 }
  0xee   :  { %v208_v26 = vadd.f32 1.0, %v482_v24 }
  0xef   :  { %487 = vrcp.f32 %v207_v25 }
  0xf0   :  { %v484_v27 = vpop.eup %483  ;;  %489 = vrcp.f32 %v208_v26 }
  0xf1   :  { %v486_v28 = vpop.eup %485  ;;  %v209_v29 = vadd.f32 1.0, %v484_v27 }
  0xf2   :  { %v210_v30 = vadd.f32 1.0, %v486_v28 }
  0xf3   :  { %491 = vrcp.f32 %v209_v29 }
  0xf4   :  { %493 = vrcp.f32 %v210_v30 }
  0xf9   :  { %v488_v31 = vpop.eup %487 }
  0xfa   :  { %v490_v32 = vpop.eup %489  ;;  %v219_v33 = vmul.f32 %v488_v31, %v98_v11 }
  0xfb   :  { %v220_v34 = vmul.f32 %v490_v32, %v100_v13 }
  0xfc   :  { %v223_v35 = vmul.f32 %v219_v33, %v184_v19 }
  0xfd   :  { %v492_v36 = vpop.eup %491  ;;  %v224_v37 = vmul.f32 %v220_v34, %v186_v20 }
  0xfe   :  { %v494_v38 = vpop.eup %493  ;;  %v221_v39 = vmul.f32 %v492_v36, %v104_v15 }
  0xff   :  { %v222_v40 = vmul.f32 %v494_v38, %v106_v17  ;;  %323 = vmatprep.mubr.f32.mxu0 %v224_v37 }
 0x100   :  { %v225_v41 = vmul.f32 %v221_v39, %v190_v21  ;;  %324 = vmatmul.mubr.f32.vlgmr.msra.gmra.mrb[0].mxu0 %v223_v35 }
 0x101   :  { %v226_v42 = vmul.f32 %v222_v40, %v192_v23 }
 0x103   :  { %328 = vmatprep.mubr.f32.mxu0 %v226_v42 }
 0x104   :  { %329 = vmatmul.mubr.f32.gmra.mrb[2].mxu0 %v225_v41 }
 0x1d3   :  { %v421_v43 = vpop.f32.mrb[0].mxu0 }
 0x1d4   :  { %v422_v44 = vpop.f32.mrb[1].mxu0 }
 0x1d5   :  { %v423_v45 = vadd.f32 %v422_v44, %v421_v43 }
 0x1d7   :  { %338 = vst.msk [vmem:[#allocation2] sm:$0xff] %vm25_vm0, %v423_v45  ;;  %v424_v46 = vpop.f32.mrb[2].mxu0 }
 0x1d8   :  { %v425_v47 = vpop.f32.mrb[3].mxu0 }
 0x1d9   :  { %v426_v48 = vadd.f32 %v425_v47, %v424_v46 }
 0x1db   :  { %339 = vst.msk [vmem:[#allocation2 + $0x8] sm:$0xff] %vm25_vm0, %v426_v48 }
 0x1de   :  { %v353_v49 = vld [vmem:[#allocation2] sm:$0xff] }
 0x1df   :  { %355 = vst.msk [vmem:[#allocation3] sm:$0xff] %vm25_vm0, %v353_v49 }
 0x1e2   :  { %v354_v50 = vld [vmem:[#allocation2 + $0x8] sm:$0xff] }
 0x1e3   :  { %356 = vst.msk [vmem:[#allocation3 + $0x8] sm:$0xff] %vm25_vm0, %v354_v50 }
 0x1e4   :  { %506 = shalt.err (!%p503_p4)
}
 0x1e5   :  { %s507_s29 = scalar_lea.hbm %s716_s3, 256 }
 0x1e6   :  { %p508_p5 = scmp.ne.s32.totalorder %s716_s3, %s507_s29  ;;  %p511_p6 = scmp.lt.u32.totalorder %s507_s29, %s716_s3 }
 0x1e8   :  { %p513_p7 = pnand %p511_p6, %p508_p5 }
 0x1ea   :  { %516 = shalt.err (!%p513_p7)
}
 0x1eb   :  { %s521_s7 = smov 128   ;;  %s522_s8 = smov 8  }
 0x1ec   :  { %368 = dma.vmem_to_hbm [thread:$0]  %s363_s25, 256, %s716_s3, [#allocation4], %s521_s7, %s521_s7, %s522_s8  }
 0x1ed   :  { %517 = dma.done.wait [#allocation4], 256  }
 0x1ee   :  { %518 = vsyncadd [#allocation4], 4294967040 }
 0x1ef   :  { %372 = vsyncpa [#allocation4], 1 }

</bundles_post_ra>
